<compile_context>
chip_gen: v5e
topology: v5e:2x2
jax: 0.10.0
libtpu: 0.0.40
codegen_flags: <defaults>
</compile_context>

<pallas_src>
import jax
import jax.numpy as jnp
from jax.experimental import pallas as pl
from jax.experimental.pallas import tpu as pltpu


# ---------------------------------------------------------------------------
# Kernels
# ---------------------------------------------------------------------------

def _bmm_relu_kernel(a_ref, b_ref, o_ref):
    """Per-grid-step batched matmul (f32 MXU accumulation) + f32 ReLU."""
    # a_ref: (bt, M, K), b_ref: (bt, K, Np), o_ref: (bt, M, Np)
    h = jnp.einsum(
        "bmk,bkn->bmn", a_ref[...], b_ref[...],
        preferred_element_type=jnp.float32,
    )
    o_ref[...] = jnp.maximum(h, 0.0).astype(o_ref.dtype)


def _make_fused_bmm_relu_kernel(bt, M, K, Np):
    """Fuse the bt tiny per-batch matmuls of one grid step into one MXU pass.

    Builds a block-diagonal LHS of shape (bt*M, bt*K) (zeros off the diagonal
    blocks) against the stacked RHS (bt*K, Np), so the step issues a single
    matmul instead of bt matmuls that each use only K/256 of the MXU depth and
    pay a separate result-FIFO pop.  Only used when bt > 1 and bt*K <= 256.
    """
    def kernel(a_ref, b_ref, o_ref):
        dtype = a_ref.dtype
        # Block-diagonal LHS via sublane/lane concatenation (no reshapes,
        # no iota/division -> robust Mosaic lowering at any M, K).
        rows = []
        for i in range(bt):
            pieces = []
            if i > 0:
                pieces.append(jnp.zeros((M, i * K), dtype))
            pieces.append(a_ref[i])                       # (M, K)
            if i < bt - 1:
                pieces.append(jnp.zeros((M, (bt - 1 - i) * K), dtype))
            rows.append(pieces[0] if len(pieces) == 1
                        else jnp.concatenate(pieces, axis=1))
        lhs = jnp.concatenate(rows, axis=0)               # (bt*M, bt*K)
        rhs = jnp.concatenate([b_ref[i] for i in range(bt)], axis=0)  # (bt*K, Np)

        h = jnp.dot(lhs, rhs, preferred_element_type=jnp.float32)
        h = jnp.maximum(h, 0.0)                            # ReLU in f32 (VPU)
        for i in range(bt):
            o_ref[i] = h[i * M:(i + 1) * M, :].astype(o_ref.dtype)
    return kernel


# ---------------------------------------------------------------------------
# Sizing helpers
# ---------------------------------------------------------------------------

def _round_up(x, m):
    return ((x + m - 1) // m) * m


def _vmem_budgets():
    """(vmem_limit_bytes for the compiler, double-buffered block budget)."""
    cap = 64 * 1024 * 1024            # conservative default: v7x per-TC VMEM
    try:
        cap = int(getattr(pltpu.get_tpu_info(), "vmem_capacity_bytes", cap))
    except Exception:
        pass
    # ~48 MiB on v7x (64 MiB physical), ~96 MiB on v5e/v6e (128 MiB physical).
    vmem_limit = min(cap * 3 // 4, 96 * 1024 * 1024)
    block_budget = vmem_limit * 3 // 4  # headroom for compiler scratch
    return int(vmem_limit), int(block_budget)


def _pick_batch_tile(batch, per_batch_block_bytes, block_budget_bytes):
    """Largest divisor of `batch` whose double-buffered block footprint fits,
    while keeping >= 2 grid steps when batch > 1 (so the "parallel" grid axis
    can shard across v7x's two TensorCores and DMA/compute can overlap)."""
    def fits(bt):
        return 2 * bt * per_batch_block_bytes <= block_budget_bytes

    if not fits(1):
        # TODO(synk): add M / K tiling (f32 VMEM accumulator + pl.when
        # init/finalize on a K grid axis) for per-batch blocks that overflow
        # the VMEM budget (matters first on v7x's 64 MiB per TC).
        return 1
    cap_bt = max(batch // 2, 1)       # bt <= batch//2  =>  grid length >= 2
    candidates = [bt for bt in range(1, cap_bt + 1)
                  if batch % bt == 0 and fits(bt)]
    return max(candidates) if candidates else 1


# ---------------------------------------------------------------------------
# Forward wrapper
# ---------------------------------------------------------------------------

def node_apply_forward(node_h, edge_we, *, compute_dtype=None, out_dtype=None,
                       batch_tile=None):
    """h = relu(bmm(node_h, edge_we)) via a Pallas TPU kernel.

    node_h:  [B, M, K]    edge_we: [B, K, N]    returns [B, M, N].

    compute_dtype: optional input cast (e.g. jnp.bfloat16) to halve HBM->VMEM
      bytes and double MXU rate; accumulation and ReLU remain f32.
    out_dtype: output dtype; defaults to compute_dtype when given (halves
      output write bytes), else to node_h.dtype.
    """
    B, M, K = node_h.shape
    Bb, Kb, N = edge_we.shape
    assert B == Bb and K == Kb, "shape mismatch for bmm"

    if out_dtype is None:
        out_dtype = compute_dtype if compute_dtype is not None else node_h.dtype
    out_dtype = jnp.dtype(out_dtype)

    if compute_dtype is not None:
        # NOTE: for bf16 at scale, prefer M (sublane) tiles that are multiples
        # of 16 so packed rows aren't half-wasted; untiled small M is accepted.
        node_h = node_h.astype(compute_dtype)
        edge_we = edge_we.astype(compute_dtype)

    # Lane-dense output pad ONLY when nearly free (large N). For small N the
    # pad would inflate FLOPs / writeback and add pad+slice HBM passes, so we
    # accept masked stores instead.
    Np = N
    if N % 128 != 0 and N >= 512:
        Np = _round_up(N, 128)
        edge_we = jnp.pad(edge_we, ((0, 0), (0, 0), (0, Np - N)))

    vmem_limit_bytes, block_budget = _vmem_budgets()
    per_batch_block_bytes = (
        M * K * node_h.dtype.itemsize
        + K * Np * edge_we.dtype.itemsize
        + M * Np * out_dtype.itemsize
    )
    if batch_tile is None:
        batch_tile = _pick_batch_tile(B, per_batch_block_bytes, block_budget)
    assert B % batch_tile == 0, "batch_tile must divide the batch dimension"
    grid = (B // batch_tile,)

    # Fuse the per-step batched matmul into one block-diagonal MXU push when
    # the per-batch shapes are far below MXU-native dims.
    fuse = (batch_tile > 1 and batch_tile <= 8
            and batch_tile * K <= 256 and M <= 128 and M % 8 == 0)
    kernel = (_make_fused_bmm_relu_kernel(batch_tile, M, K, Np)
              if fuse else _bmm_relu_kernel)

    cost = pl.CostEstimate(
        flops=2 * B * M * K * Np,
        transcendentals=0,
        bytes_accessed=(
            node_h.size * node_h.dtype.itemsize
            + edge_we.size * edge_we.dtype.itemsize
            + B * M * Np * out_dtype.itemsize
        ),
    )

    out = pl.pallas_call(
        kernel,
        out_shape=jax.ShapeDtypeStruct((B, M, Np), out_dtype),
        grid_spec=pltpu.PrefetchScalarGridSpec(
            num_scalar_prefetch=0,
            grid=grid,
            in_specs=[
                pl.BlockSpec((batch_tile, M, K), lambda b: (b, 0, 0)),
                pl.BlockSpec((batch_tile, K, Np), lambda b: (b, 0, 0)),
            ],
            out_specs=pl.BlockSpec((batch_tile, M, Np), lambda b: (b, 0, 0)),
        ),
        compiler_params=pltpu.CompilerParams(
            # Independent batch chunks -> shard across TCs on v7x
            # (near-neutral on single-TC v5e/v6e).
            dimension_semantics=("parallel",),
            vmem_limit_bytes=vmem_limit_bytes,
        ),
        cost_estimate=cost,
    )(node_h, edge_we)

    if Np != N:
        out = out[:, :, :N]
    return out


class NodeApplyModuleJAX:
    """JAX/Pallas port of NodeApplyModule.

    `weight_whole` (num_ref, out_feats, in_feats) mirrors the PyTorch __init__
    but — exactly like the reference forward — it is NOT used in the forward
    pass.  The activation is ReLU; any other JAX-traceable elementwise
    activation can be slotted into the kernel epilogue the same way.
    """

    def __init__(self, num_ref, in_feats, out_feats, key,
                 compute_dtype=None, out_dtype=None):
        self.weight_whole = jax.random.normal(
            key, (num_ref, out_feats, in_feats), dtype=jnp.float32)
        self.compute_dtype = compute_dtype
        self.out_dtype = out_dtype

    def forward(self, node_h, edge_we):
        h = node_apply_forward(node_h, edge_we,
                               compute_dtype=self.compute_dtype,
                               out_dtype=self.out_dtype)
        return {"h": h}


if __name__ == "__main__":
    key = jax.random.PRNGKey(0)
    k_w, k_h, k_e, k_h2, k_e2 = jax.random.split(key, 5)

    # Small shapes consistent with the forward: bmm([B, M, K], [B, K, N]).
    B, M, K, N = 3, 8, 16, 32  # num_ref=3, nodes=8, in_feats=16, out_feats=32

    node_h = jax.random.normal(k_h, (B, M, K), dtype=jnp.float32)
    edge_we = jax.random.normal(k_e, (B, K, N), dtype=jnp.float32)

    module = NodeApplyModuleJAX(num_ref=B, in_feats=K, out_feats=N, key=k_w)

    # 1) f32 path — exact semantics of the reference module (no lane pad,
    #    grid=(3,) with batch_tile=1).
    out = jax.block_until_ready(module.forward(node_h, edge_we)["h"])
    ref = jnp.maximum(jnp.einsum("bmk,bkn->bmn", node_h, edge_we), 0.0)
    assert out.shape == (B, M, N) and out.dtype == jnp.float32
    assert jnp.allclose(out, ref, atol=1e-5, rtol=1e-5)

    # 2) bf16 inputs + bf16 output (f32 MXU accumulation and f32 ReLU inside).
    out_bf16 = jax.block_until_ready(
        node_apply_forward(node_h, edge_we, compute_dtype=jnp.bfloat16))
    ref_bf16 = jnp.maximum(
        jnp.einsum("bmk,bkn->bmn",
                   node_h.astype(jnp.bfloat16), edge_we.astype(jnp.bfloat16),
                   preferred_element_type=jnp.float32),
        0.0).astype(jnp.bfloat16)
    assert out_bf16.shape == (B, M, N) and out_bf16.dtype == jnp.bfloat16
    assert jnp.allclose(out_bf16.astype(jnp.float32),
                        ref_bf16.astype(jnp.float32), atol=2e-2, rtol=2e-2)

    # 3) Even batch (B=4): exercises the >=2-step "parallel" grid
    #    (batch_tile=2) and the fused block-diagonal single-MXU-push path.
    B2 = 4
    node_h2 = jax.random.normal(k_h2, (B2, M, K), dtype=jnp.float32)
    edge_we2 = jax.random.normal(k_e2, (B2, K, N), dtype=jnp.float32)
    out2 = jax.block_until_ready(node_apply_forward(node_h2, edge_we2))
    ref2 = jnp.maximum(jnp.einsum("bmk,bkn->bmn", node_h2, edge_we2), 0.0)
    assert out2.shape == (B2, M, N) and out2.dtype == jnp.float32
    assert jnp.allclose(out2, ref2, atol=1e-5, rtol=1e-5)

    print("KERNEL_OK")
</pallas_src>

<mosaic_0001>
module attributes {stable_mosaic.version = 11 : i64} {
  func.func @_bmm_relu_kernel(%arg0: i32, %arg1: memref<1x8x16xf32, #tpu.memory_space<vmem>>, %arg2: memref<1x16x32xf32, #tpu.memory_space<vmem>>, %arg3: memref<1x8x32xf32, #tpu.memory_space<vmem>>) attributes {dimension_semantics = [#tpu.dimension_semantics<parallel>], iteration_bounds = array<i64: 3>, scalar_prefetch = 0 : i64, scratch_operands = 0 : i64, tpu.core_type = #tpu.core_type<tc>, window_params = [{transform_indices = @transform_0, window_bounds = array<i64: 1, 8, 16>}, {transform_indices = @transform_1, window_bounds = array<i64: 1, 16, 32>}, {transform_indices = @transform_2, window_bounds = array<i64: 1, 8, 32>}]} {
    %c0 = arith.constant 0 : index
    %c0_0 = arith.constant 0 : index
    %c0_1 = arith.constant 0 : index
    %0 = vector.load %arg1[%c0, %c0_0, %c0_1] : memref<1x8x16xf32, #tpu.memory_space<vmem>>, vector<1x8x16xf32>
    %c0_2 = arith.constant 0 : index
    %c0_3 = arith.constant 0 : index
    %c0_4 = arith.constant 0 : index
    %1 = vector.load %arg2[%c0_2, %c0_3, %c0_4] : memref<1x16x32xf32, #tpu.memory_space<vmem>>, vector<1x16x32xf32>
    "tpu.trace_start"() <{level = 10 : i32, message = "bmk,bkn->bmn"}> : () -> ()
    %cst = arith.constant dense<0.000000e+00> : vector<1x8x32xf32>
    %2 = tpu.matmul %0, %1, %cst {dimension_numbers = #tpu.dot_dimension_numbers<[2], [1], [1], [2], [0, 0, 0, 1, 1, 2], [0], [0]>} : vector<1x8x16xf32>, vector<1x16x32xf32>, vector<1x8x32xf32> -> vector<1x8x32xf32>
    "tpu.trace_stop"() : () -> ()
    %cst_5 = arith.constant 0.000000e+00 : f32
    %3 = vector.broadcast %cst_5 : f32 to vector<1x8x32xf32>
    %4 = arith.maximumf %2, %3 : vector<1x8x32xf32>
    %c0_6 = arith.constant 0 : index
    %c0_7 = arith.constant 0 : index
    %c0_8 = arith.constant 0 : index
    %5 = vector.load %arg3[%c0_6, %c0_7, %c0_8] : memref<1x8x32xf32, #tpu.memory_space<vmem>>, vector<1x8x32xf32>
    tpu.vector_store %arg3[%c0_6, %c0_7, %c0_8], %4 {strides = array<i32>} : memref<1x8x32xf32, #tpu.memory_space<vmem>>, vector<1x8x32xf32>,
    return
  }
  func.func @transform_0(%arg0: i32) -> (i32, i32, i32) {
    %c0_i32 = arith.constant 0 : i32
    %c0_i32_0 = arith.constant 0 : i32
    %c0_i32_1 = arith.constant 0 : i32
    return %arg0, %c0_i32, %c0_i32_0 : i32, i32, i32
  }
  func.func @transform_1(%arg0: i32) -> (i32, i32, i32) {
    %c0_i32 = arith.constant 0 : i32
    %c0_i32_0 = arith.constant 0 : i32
    %c0_i32_1 = arith.constant 0 : i32
    return %arg0, %c0_i32, %c0_i32_0 : i32, i32, i32
  }
  func.func @transform_2(%arg0: i32) -> (i32, i32, i32) {
    %c0_i32 = arith.constant 0 : i32
    %c0_i32_0 = arith.constant 0 : i32
    %c0_i32_1 = arith.constant 0 : i32
    return %arg0, %c0_i32, %c0_i32_0 : i32, i32, i32
  }
}

</mosaic_0001>

<bundles_post_ra>
// kernel: tpu_custom_call.1
= control target key start
LH: loop header
LB: loop body
LE: loop exit
PB: predicated region body
PF: predicated region fallthrough
CT: control target
= control target key end

     0   :  { %7 = vsyncpa [#allocation3], 0  ;;  %s723_s0 = inlined_call_operand.hbm [shape: f32[3,8,16], index: 0, kind: input, shape index: {}]   ;;  %s724_s1 = inlined_call_operand.hbm [shape: f32[3,16,32], index: 1, kind: input, shape index: {}]   ;;  %s725_s2 = inlined_call_operand.hbm [shape: f32[3,8,32], index: 2, kind: output, shape index: {}]  }
   0x1   :  { %9 = vsyncpa [#allocation3 + $0x1], 0 }
   0x2   :  { %10 = vsyncpa [#allocation6], 0 }
   0x3   :  { %12 = vsyncpa [#allocation6 + $0x1], 0 }
   0x4   :  { %13 = vsyncpa [#allocation4], 0 }
   0x5   :  { %15 = vsyncpa [#allocation4 + $0x1], 0  ;;  %s562_s9 = smov 0   ;;  %s564_s10 = smov 0  }
   0x6   :  { %s566_s11 = smov 0   ;;  %s568_s12 = smov 0  }
   0x7 LB: > { %s583_s13 = sadd.s32 4294967295, %s543_s12   ;;  %s342_s14 = sadd.s32 4294967294, %s543_s12   ;;  %s543_s12 = sphi %s568_s12, %s735_s12   ;;  %s539_s11 = sphi %s566_s11, %s734_s11   ;;  %s535_s10 = sphi %s564_s10, %s733_s10   ;;  %s531_s9 = sphi %s562_s9, %s732_s9  }
   0x8   : > { %s587_s15 = sadd.s32 1, %s543_s12   ;;  %s28_s16 = sadd.s32 1, %s539_s11 }
   0x9   : > { %s25_s17 = ssub.s32 %s543_s12, %s587_s15  ;;  %p35_p0 = scmp.ne.s32.totalorder %s539_s11, %s535_s10 }
   0xa   : > { %p26_p1 = scmp.eq.s32.totalorder %s25_s17, 0  ;;  %p36_p2 = scmp.eq.s32.totalorder %s543_s12, 0 }
   0xb   : > { %p41_p3 = scmp.ne.s32.totalorder %s535_s10, %s531_s9  ;;  %p42_p4 = scmp.eq.s32.totalorder %s583_s13, 0 }
   0xc   : > { %s599_s18 = scalar_select %p26_p1, %s539_s11, %s28_s16  }
   0xd   : > { %p601_p5 = por %p36_p2, %p35_p0  ;;  %p605_p6 = por %p42_p4, %p41_p3 }
   0xe   : > { %p91_p7 = scmp.eq.s32.totalorder %s583_s13, 2  ;;  %p97_p8 = scmp.eq.s32.totalorder %s342_s14, 2 }
   0xf   : > { %p377_p9 = scmp.lt.s32.totalorder %s543_s12, 3  ;;  %s620_s23 = sand.u32 1, %s539_s11  }
  0x10   : > { %p611_p10 = por %p91_p7, %p35_p0  ;;  %p615_p11 = por %p97_p8, %p41_p3 }
  0x11   : > { %s346_s24 = sshll.u32 %s543_s12, 3  ;;  %s345_s25 = sshll.u32 %s620_s23, 3 }
  0x12   : > { %s125_s28 = scalar_lea.hbm %s723_s0, %s346_s24  ;;  %s121_s30 = scalar_lea.vmem [#allocation2], %s345_s25 }
  0x13   : > { %s127_s29 = sshll.u32 %s125_s28, 4  ;;  %s129_s3 = sshll.u32 %s121_s30, 4  ;;  %s128_s29 = int_to_ptr.hbm [resolvable:$true] %s127_s29  ;;  %s130_s3 = int_to_ptr.vmem [resolvable:$true] %s129_s3 }
  0x14   : > { %p629_p12 = pnand %p377_p9, %p601_p5  ;;  %p350_p13 = scmp.ge.s32.totalorder %s543_s12, 1 }
  0x15   : > { %p156_p0 = scmp.lt.s32.totalorder %s543_s12, 4  ;;  %s347_s5 = sshll.u32 %s620_s23, 4 }
  0x16   : > { %s118_s6 = scalar_lea.sflag [#allocation3], %s620_s23  ;;  %s413_s7 = sshra.s32 %s128_s29, 4  ;;  %s414_s7 = int_to_ptr.hbm [resolvable:$true] %s413_s7 }
  0x17   : > { %s415_s8 = scalar_lea.hbm %s414_s7, 8  ;;  %p417_p2 = pneg %p629_p12 }
  0x18   : > { %p416_p1 = scmp.ne.s32.totalorder %s414_s7, %s415_s8  ;;  %s420_s17 = scalar_lea.hbm %s723_s0, 24 }
  0x19   : > { %p421_p5 = scmp.lt.s32.totalorder %s414_s7, %s723_s0  ;;  %p422_p7 = scmp.lt.s32.totalorder %s420_s17, %s415_s8 }
  0x1a   : > { %p418_p3 = pnand %p417_p2, %p416_p1 }
  0x1b   : > { %p423_p8 = por %p422_p7, %p421_p5 }
  0x1c   : > { %p419_p4 = pneg %p418_p3 }
  0x1e   : > { %p424_p9 = pnand %p423_p8, %p419_p4 }
  0x20   : > { %427 = shalt.err (!%p424_p9)
}
  0x21   : > { %369 = dma.hbm_to_vmem [thread:$0]  (!%p629_p12), %s128_s29, 128, %s130_s3, %s118_s6  }
  0x22   : > { %p654_p1 = pnand %p350_p13, %p156_p0  ;;  %s359_s26 = sshll.u32 %s543_s12, 4 }
  0x23   : > { %s140_s27 = scalar_lea.vmem [#allocation5], %s347_s5  ;;  %s145_s8 = scalar_lea.hbm %s724_s1, %s359_s26 }
  0x24   : > { %s148_s28 = sshll.u32 %s140_s27, 4  ;;  %s146_s14 = sshll.u32 %s145_s8, 4  ;;  %s149_s28 = int_to_ptr.vmem [resolvable:$true] %s148_s28  ;;  %s147_s14 = int_to_ptr.hbm [resolvable:$true] %s146_s14 }
  0x25   : > { %s137_s16 = scalar_lea.sflag [#allocation6], %s620_s23  ;;  %s443_s17 = sshra.s32 %s147_s14, 4  ;;  %s444_s17 = int_to_ptr.hbm [resolvable:$true] %s443_s17 }
  0x26   : > { %s445_s29 = scalar_lea.hbm %s444_s17, 16  ;;  %s450_s5 = scalar_lea.hbm %s724_s1, 48 }
  0x27   : > { %p446_p3 = scmp.ne.s32.totalorder %s444_s17, %s445_s29  ;;  %p451_p4 = scmp.lt.s32.totalorder %s444_s17, %s724_s1 }
  0x28   : > { %p452_p5 = scmp.lt.s32.totalorder %s450_s5, %s445_s29 }
  0x29   : > { %p448_p13 = pnand %p446_p3, %p417_p2 }
  0x2a   : > { %p453_p7 = por %p452_p5, %p451_p4 }
  0x2b   : > { %p449_p0 = pneg %p448_p13 }
  0x2d   : > { %p454_p8 = pnand %p453_p7, %p449_p0 }
  0x2f   : > { %457 = shalt.err (!%p454_p8)
}
  0x30   : > { %s545_s23 = smov 128   ;;  %s546_s26 = smov 8  }
  0x31   : > { %372 = dma.hbm_to_vmem [thread:$0]  (!%p629_p12), %s147_s14, 256, %s149_s28, %s137_s16, %s545_s23, %s545_s23, %s546_s26  }
  0x32   : > { %160 = sbr.rel (%p654_p1) target bundleno = 194 (0xc2), region = 28  ;;  %s677_s27 = sand.u32 (!%p654_p1), 1, %s535_s10  }
  0x33   : > { %s351_s30 = sshll.u32 (!%p654_p1), %s677_s27, 3  ;;  %s163_s7 = scalar_lea.sflag (!%p654_p1), [#allocation3], %s677_s27 }
  0x34   : > { %s166_s8 = scalar_lea.vmem (!%p654_p1), [#allocation2], %s351_s30 }
  0x37   : > { %518 = dma.done.wait (%p605_p6), %s163_s7, 128  }
  0x38   : > { %520 = vsyncadd (%p605_p6), %s163_s7, 4294967168  ;;  %s352_s4 = sshll.u32 %s677_s27, 4  ;;  %s173_s25 = scalar_lea.sflag [#allocation6], %s677_s27 }
  0x39   : > { %s176_s28 = scalar_lea.vmem [#allocation5], %s352_s4 }
  0x3a   : > { %522 = dma.done.wait (%p605_p6), %s173_s25, 256  }
  0x3b   : > { %524 = vsyncadd (%p605_p6), %s173_s25, 4294967040  ;;  %v205_v0 = vld [vmem:[%s176_s28 + $0x8] sm:$0xff]  ;;  %v204_v1 = vld [vmem:[%s176_s28] sm:$0xff]  ;;  %vm206_vm0 = vcmask 130048   ;;  %s356_s14 = sshll.u32 %s583_s13, 3  ;;  %s202_s3 = scalar_lea.vmem [#allocation7], %s351_s30 }
  0x3c   : > { %224 = vmatpush.msra.mxu0 %v205_v0  ;;  %v203_v2 = vld [vmem:[%s166_s8] sm:$0xff]  ;;  %s244_s29 = scalar_lea.hbm %s725_s2, %s356_s14  ;;  %s246_s6 = sshll.u32 %s202_s3, 4  ;;  %vm231_vm1 = vcmask 261120   ;;  %s247_s6 = int_to_ptr.vmem [resolvable:$true] %s246_s6 }
  0x3d   : > { %s248_s5 = sshll.u32 %s244_s29, 4  ;;  %s234_s20 = scalar_lea.sflag [#allocation4], %s677_s27  ;;  %s249_s5 = int_to_ptr.hbm [resolvable:$true] %s248_s5 }
  0x3e   : > { %225 = vmatpush.msra.mxu0 %v204_v1  ;;  %s487_s19 = sshra.s32 %s249_s5, 4  ;;  %s493_s26 = scalar_lea.hbm %s725_s2, 24  ;;  %s488_s19 = int_to_ptr.hbm [resolvable:$true] %s487_s19 }
  0x3f   : > { %354 = vmatmul.msk.f32.vlgmr.msra.gmra.mxu0 %vm206_vm0, %v203_v2  ;;  %s489_s24 = scalar_lea.hbm %s488_s19, 8  ;;  %p494_p9 = scmp.lt.s32.totalorder %s488_s19, %s725_s2 }
  0x40   : > { %p490_p6 = scmp.ne.s32.totalorder %s488_s19, %s489_s24  ;;  %p495_p1 = scmp.lt.s32.totalorder %s493_s26, %s489_s24 }
  0x42   : > { %p491_p12 = pnand %p490_p6, %p611_p10  ;;  %p496_p3 = por %p495_p1, %p494_p9 }
  0x44   : > { %p492_p2 = pneg %p491_p12 }
  0x46   : > { %p497_p13 = pnand %p496_p3, %p492_p2 }
  0xbc   : > { %v227_v3 = vpop.f32.mrf.mxu0 }
  0xbd   : > { %v230_v4 = vmax.f32 %v227_v3, 0.0 }
  0xbf   : > { %232 = vst.msk [vmem:[%s202_s3] sm:$0xff] %vm231_vm1, %v230_v4 }
  0xc0   : > { %500 = shalt.err (!%p497_p13)
}
  0xc1   : > { %364 = dma.vmem_to_hbm [thread:$0]  (%p611_p10), %s247_s6, 128, %s249_s5, %s234_s20  }
  0xc2 PF: > { %p378_p0 = scmp.ge.s32.totalorder %s543_s12, 2  ;;  %s260_s27 = sand.u32 1, %s531_s9  }
  0xc3   : > { %s261_s8 = scalar_lea.sflag [#allocation4], %s260_s27 }
  0xc4   : > { %p374_p4 = pnand %p378_p0, %p615_p11 }
  0xc6   : > { %p375_p5 = pneg %p374_p4 }
  0xc8   : > { %526 = dma.done.wait (%p375_p5), %s261_s8, 128  }
  0xc9   : > { %528 = vsyncadd (%p375_p5), %s261_s8, 4294967168  ;;  %p18_p7 = scmp.ge.s32.totalorder %s587_s15, 5   ;;  %s732_s9 = smov %s535_s10 }
  0xca   : > { %s733_s10 = smov %s539_s11  ;;  %s734_s11 = smov %s599_s18 }
  0xcb   : > { %s735_s12 = smov %s587_s15  ;;  %20 = sbr.rel (!%p18_p7) target bundleno = 7 (0x7), region = 86 }
  0xd0   :  { %267 = vsyncpa [#allocation3], 1 }
  0xd1   :  { %269 = vsyncpa [#allocation3 + $0x1], 1 }
  0xd2   :  { %270 = vsyncpa [#allocation6], 1 }
  0xd3   :  { %272 = vsyncpa [#allocation6 + $0x1], 1 }
  0xd4   :  { %273 = vsyncpa [#allocation4], 1 }
  0xd5   :  { %275 = vsyncpa [#allocation4 + $0x1], 1 }

</bundles_post_ra>
